<compile_context>
chip_gen: v7x
topology: tpu7x:2x2x1
jax: 0.10.0
libtpu: 0.0.40
codegen_flags: <defaults>
</compile_context>

<pallas_src>
import jax
import jax.numpy as jnp
from jax import lax
from jax.experimental import pallas as pl
from jax.experimental.pallas import tpu as pltpu

EPS = 1e-5


def _layernorm_f32(x_ref, g_ref, b_ref):
    x = x_ref[...].astype(jnp.float32)
    mean = jnp.mean(x, axis=-1, keepdims=True)
    xc = x - mean
    var = jnp.mean(xc * xc, axis=-1, keepdims=True)
    xn = xc * lax.rsqrt(var + EPS)
    return xn * g_ref[...].astype(jnp.float32) + b_ref[...].astype(jnp.float32)


def lmhead_kernel(x_ref, g_ref, b_ref, w_ref, bias_ref, o_ref, y_scratch):
    # Row-tiled path: LN once per row tile (j == 0), carried across the vocab
    # ("arbitrary", sequential) axis in a VMEM scratch in the matmul dtype.
    #   x_ref:    (TM, H)   row tile of flattened activations
    #   g_ref:    (1, H)    layernorm gamma
    #   b_ref:    (1, H)    layernorm beta
    #   w_ref:    (H, TN)   contiguous vocab tile of the pre-tiled weight
    #   bias_ref: (1, TN)   vocab tile of the lm_head bias
    #   o_ref:    (TM, TN)  logits tile
    #   y_scratch:(TM, H)   normalized activations carried across the vocab axis
    @pl.when(pl.program_id(1) == 0)
    def _():
        y_scratch[...] = _layernorm_f32(x_ref, g_ref, b_ref).astype(y_scratch.dtype)

    # Pure MXU work on the hot path: (TM,H) x (H,TN), f32 accumulation.
    logits = jnp.dot(y_scratch[...], w_ref[...],
                     preferred_element_type=jnp.float32)
    logits = logits + bias_ref[...].astype(jnp.float32)
    o_ref[...] = logits.astype(o_ref.dtype)


def lmhead_vocab_parallel_kernel(x_ref, g_ref, b_ref, w_ref, bias_ref, o_ref):
    # Decode path (single row tile): recompute LN at every vocab step (O(tm*H),
    # negligible vs the matmul) so there is NO carried scratch and the vocab
    # axis can be "parallel" (megacore-shardable across both v7x TensorCores).
    y = _layernorm_f32(x_ref, g_ref, b_ref).astype(w_ref.dtype)
    logits = jnp.dot(y, w_ref[...], preferred_element_type=jnp.float32)
    logits = logits + bias_ref[...].astype(jnp.float32)
    o_ref[...] = logits.astype(o_ref.dtype)


def pretile_weight(w_t, tile_n):
    """(H, V) -> (V//tile_n, H, tile_n): contiguous vocab tiles for fast DMA.
    Production callers should call this ONCE at load time and pass the 3-D
    pre-tiled weight to lm_head_forward."""
    H, V = w_t.shape
    assert V % tile_n == 0, "vocab must be a multiple of tile_n"
    return jnp.transpose(w_t.reshape(H, V // tile_n, tile_n), (1, 0, 2))


def _itemsize(dt):
    return jnp.dtype(dt).itemsize


def lm_head_forward(x, gamma, beta, w_t, bias, *, tm=None, tile_n=None,
                    x_buffers=2):
    """x: [B, S, H]; gamma/beta: [H]; bias: [V].
    w_t: either [H, V] (transposed nn.Linear weight; will be pre-tiled here) or
         the already pre-tiled [V//tile_n, H, tile_n] layout (preferred).
    Returns [B, S, V] logits in x.dtype.

    Tiling knobs (per generation):
      v6e:  tm=512..768, tile_n=512  (ridge ~650 FLOPs / weight byte)
      v7x:  tm=512, tile_n=512, x_buffers=1 (fits 64 MiB/TC VMEM)
      v5e:  tm=256, tile_n=512 (ridge ~240), vmem_limit raised past 16 MiB default
    """
    B, S, H = x.shape
    rows = B * S

    # ---- weight layout + tile_n ------------------------------------------
    if w_t.ndim == 3:
        n_vtiles, Hw, tn_w = w_t.shape
        assert Hw == H
        if tile_n is None:
            tile_n = tn_w
        assert tile_n == tn_w, "tile_n must match the pre-tiled weight layout"
        V = n_vtiles * tn_w
        w_tiled = w_t
    else:
        Hw, V = w_t.shape
        assert Hw == H
        if tile_n is None:
            tile_n = min(512, V)
        assert V % tile_n == 0, "vocab must be a multiple of tile_n"
        w_tiled = pretile_weight(w_t, tile_n)
    assert tile_n == V or tile_n % 128 == 0, "tile_n must be a multiple of 128"

    # ---- tm ----------------------------------------------------------------
    if tm is None:
        tm = rows if rows <= 512 else 512
    assert rows % tm == 0, "rows must be a multiple of tm"
    assert tm == rows or tm % 8 == 0, "tm must be a multiple of 8 (sublane)"

    x2 = x.reshape(rows, H)
    g2 = gamma.reshape(1, H)
    b2 = beta.reshape(1, H)
    bias2 = bias.reshape(1, V)

    compute_dtype = w_tiled.dtype   # matmul compute dtype follows the weight
    out_dtype = x.dtype
    row_tiles = rows // tm
    vocab_parallel = (row_tiles == 1)   # decode-shaped: shard vocab across TCs
    grid = (row_tiles, V // tile_n)     # rows outer, vocab inner (fastest)

    # ---- explicit VMEM budget (review item #1) -----------------------------
    w_bytes = 2 * H * tile_n * _itemsize(w_tiled.dtype)           # dbl-buffered
    x_bytes = max(x_buffers, 1) * tm * H * _itemsize(x.dtype)
    o_bytes = 2 * tm * tile_n * _itemsize(out_dtype)
    y_bytes = 0 if vocab_parallel else tm * H * _itemsize(compute_dtype)
    small_bytes = 2 * (2 * H * 4) + 2 * tile_n * 4                # gamma/beta/bias
    working = w_bytes + x_bytes + o_bytes + y_bytes + small_bytes
    vmem_limit = int(working * 1.3) + (4 << 20)
    vmem_limit = max(vmem_limit, 16 << 20)
    try:
        phys = int(pltpu.get_tpu_info().vmem_capacity_bytes)
    except Exception:
        phys = 128 << 20
    vmem_limit = min(vmem_limit, phys - (2 << 20))

    # ---- specs --------------------------------------------------------------
    if x_buffers == 1:
        # v7x: single-buffer the activations (only read at j == 0 / once per row
        # tile); frees tm*H bytes of VMEM for bigger tm / deeper weight buffers.
        x_spec = pl.BlockSpec((tm, H), lambda i, j: (i, 0),
                              pipeline_mode=pl.Buffered(1))
    else:
        x_spec = pl.BlockSpec((tm, H), lambda i, j: (i, 0))

    in_specs = [
        x_spec,                                               # activations
        pl.BlockSpec((1, H), lambda i, j: (0, 0)),            # gamma
        pl.BlockSpec((1, H), lambda i, j: (0, 0)),            # beta
        pl.BlockSpec((None, H, tile_n), lambda i, j: (j, 0, 0)),  # contiguous weight tile
        pl.BlockSpec((1, tile_n), lambda i, j: (0, j)),       # bias tile
    ]
    out_spec = pl.BlockSpec((tm, tile_n), lambda i, j: (i, j))

    if vocab_parallel:
        kernel = lmhead_vocab_parallel_kernel
        scratch_shapes = []
        dim_sem = ("parallel", "parallel")      # no carried scratch -> safe
    else:
        kernel = lmhead_kernel
        scratch_shapes = [pltpu.VMEM((tm, H), compute_dtype)]  # LN result carry
        dim_sem = ("parallel", "arbitrary")     # vocab carries the LN scratch

    out = pl.pallas_call(
        kernel,
        out_shape=jax.ShapeDtypeStruct((rows, V), out_dtype),
        grid_spec=pltpu.PrefetchScalarGridSpec(
            num_scalar_prefetch=0,
            grid=grid,
            in_specs=in_specs,
            out_specs=out_spec,
            scratch_shapes=scratch_shapes,
        ),
        compiler_params=pltpu.CompilerParams(
            dimension_semantics=dim_sem,
            vmem_limit_bytes=vmem_limit),
    )(x2, g2, b2, w_tiled, bias2)

    return out.reshape(B, S, V)


def reference(x, gamma, beta, w_t, bias):
    """Pure-JAX reference mirroring the kernel's precision path:
    LN in f32, activations cast to the weight dtype, f32-accumulated matmul."""
    xf = x.astype(jnp.float32)
    mean = jnp.mean(xf, axis=-1, keepdims=True)
    var = jnp.mean((xf - mean) ** 2, axis=-1, keepdims=True)
    xn = (xf - mean) / jnp.sqrt(var + EPS)
    y = xn * gamma.astype(jnp.float32) + beta.astype(jnp.float32)
    y = y.astype(w_t.dtype).astype(jnp.float32)
    logits = y @ w_t.astype(jnp.float32) + bias.astype(jnp.float32)
    return logits.astype(x.dtype)


if __name__ == "__main__":
    # Small shapes implied by the forward: [batch, seq, hidden] -> [batch, seq, vocab]
    B, S, H, V = 2, 8, 32, 256

    key = jax.random.PRNGKey(0)
    kx, kg, kb, kw, kbias = jax.random.split(key, 5)

    # bf16 activations / weights (the weight-streaming-friendly path);
    # LayerNorm params and bias kept in f32.
    x = jax.random.normal(kx, (B, S, H), dtype=jnp.float32).astype(jnp.bfloat16)
    gamma = 1.0 + 0.1 * jax.random.normal(kg, (H,), dtype=jnp.float32)
    beta = 0.1 * jax.random.normal(kb, (H,), dtype=jnp.float32)
    # PyTorch nn.Linear weight is [V, H]; stored pre-transposed [H, V] in bf16.
    w_t = (jax.random.normal(kw, (H, V), dtype=jnp.float32)
           / jnp.sqrt(H)).astype(jnp.bfloat16)
    bias = 0.01 * jax.random.normal(kbias, (V,), dtype=jnp.float32)

    ref = reference(x, gamma, beta, w_t, bias)

    # 1) Row-tiled prefill path: tm=8 / tile_n=128 -> 2x2 grid (exercises row
    #    tiling, the LN carry across vocab steps, and the pre-tiled weight DMA).
    out = lm_head_forward(x, gamma, beta, w_t, bias, tm=8, tile_n=128)
    out = jax.block_until_ready(out)
    assert out.shape == (B, S, V)
    assert out.dtype == x.dtype
    assert jnp.allclose(out.astype(jnp.float32), ref.astype(jnp.float32),
                        atol=2e-2, rtol=2e-2)

    # 2) Decode-shaped path: rows fit one tile -> scratch-free kernel, vocab
    #    axis "parallel" (both v7x TensorCores usable).  Weight pre-tiled once.
    w_pretiled = pretile_weight(w_t, 128)
    x_dec = x[:, :1, :]
    out_dec = lm_head_forward(x_dec, gamma, beta, w_pretiled, bias, tile_n=128)
    out_dec = jax.block_until_ready(out_dec)
    ref_dec = reference(x_dec, gamma, beta, w_t, bias)
    assert out_dec.shape == (B, 1, V)
    assert jnp.allclose(out_dec.astype(jnp.float32), ref_dec.astype(jnp.float32),
                        atol=2e-2, rtol=2e-2)

    print("KERNEL_OK")
</pallas_src>

<mosaic_0001>
module attributes {stable_mosaic.version = 11 : i64} {
  func.func @lmhead_kernel(%arg0: i32, %arg1: i32, %arg2: memref<8x32xbf16, #tpu.memory_space<vmem>>, %arg3: memref<1x32xf32, #tpu.memory_space<vmem>>, %arg4: memref<1x32xf32, #tpu.memory_space<vmem>>, %arg5: memref<1x32x128xbf16, #tpu.memory_space<vmem>>, %arg6: memref<1x128xf32, #tpu.memory_space<vmem>>, %arg7: memref<8x128xbf16, #tpu.memory_space<vmem>>, %arg8: memref<8x32xbf16, #tpu.memory_space<vmem>>) attributes {dimension_semantics = [#tpu.dimension_semantics<parallel>, #tpu.dimension_semantics<arbitrary>], iteration_bounds = array<i64: 2, 2>, scalar_prefetch = 0 : i64, scratch_operands = 1 : i64, tpu.core_type = #tpu.core_type<tc>, window_params = [{transform_indices = @transform_0, window_bounds = array<i64: 8, 32>}, {pipeline_mode = #tpu.pipeline_mode<synchronous>, transform_indices = @transform_1, window_bounds = array<i64: 1, 32>}, {pipeline_mode = #tpu.pipeline_mode<synchronous>, transform_indices = @transform_2, window_bounds = array<i64: 1, 32>}, {transform_indices = @transform_3, window_bounds = array<i64: 1, 32, 128>}, {transform_indices = @transform_4, window_bounds = array<i64: 1, 128>}, {transform_indices = @transform_5, window_bounds = array<i64: 8, 128>}]} {
    %c0_i32 = arith.constant 0 : i32
    %0 = arith.cmpi eq, %arg1, %c0_i32 : i32
    %1 = arith.extui %0 : i1 to i32
    %c0_i32_0 = arith.constant 0 : i32
    %2 = arith.cmpi ne, %1, %c0_i32_0 : i32
    scf.if %2 {
      %c0_9 = arith.constant 0 : index
      %c0_10 = arith.constant 0 : index
      %12 = vector.load %arg2[%c0_9, %c0_10] : memref<8x32xbf16, #tpu.memory_space<vmem>>, vector<8x32xbf16>
      %13 = arith.extf %12 : vector<8x32xbf16> to vector<8x32xf32>
      %cst_11 = arith.constant dense<0.000000e+00> : vector<8xf32>
      %14 = vector.multi_reduction <add>, %13, %cst_11 [1] : vector<8x32xf32> to vector<8xf32>
      %15 = vector.shape_cast %14 : vector<8xf32> to vector<8x1xf32>
      %cst_12 = arith.constant 3.200000e+01 : f32
      %16 = vector.broadcast %cst_12 : f32 to vector<8x1xf32>
      %17 = arith.divf %15, %16 : vector<8x1xf32>
      %18 = vector.broadcast %17 : vector<8x1xf32> to vector<8x32xf32>
      %19 = arith.subf %13, %18 : vector<8x32xf32>
      %20 = arith.mulf %19, %19 : vector<8x32xf32>
      %cst_13 = arith.constant dense<0.000000e+00> : vector<8xf32>
      %21 = vector.multi_reduction <add>, %20, %cst_13 [1] : vector<8x32xf32> to vector<8xf32>
      %22 = vector.shape_cast %21 : vector<8xf32> to vector<8x1xf32>
      %cst_14 = arith.constant 3.200000e+01 : f32
      %23 = vector.broadcast %cst_14 : f32 to vector<8x1xf32>
      %24 = arith.divf %22, %23 : vector<8x1xf32>
      %cst_15 = arith.constant 9.99999974E-6 : f32
      %25 = vector.broadcast %cst_15 : f32 to vector<8x1xf32>
      %26 = arith.addf %24, %25 : vector<8x1xf32>
      %27 = math.rsqrt %26 : vector<8x1xf32>
      %28 = vector.broadcast %27 : vector<8x1xf32> to vector<8x32xf32>
      %29 = arith.mulf %19, %28 : vector<8x32xf32>
      %c0_16 = arith.constant 0 : index
      %c0_17 = arith.constant 0 : index
      %30 = vector.load %arg3[%c0_16, %c0_17] : memref<1x32xf32, #tpu.memory_space<vmem>>, vector<1x32xf32>
      %31 = vector.broadcast %30 : vector<1x32xf32> to vector<8x32xf32>
      %32 = arith.mulf %29, %31 : vector<8x32xf32>
      %c0_18 = arith.constant 0 : index
      %c0_19 = arith.constant 0 : index
      %33 = vector.load %arg4[%c0_18, %c0_19] : memref<1x32xf32, #tpu.memory_space<vmem>>, vector<1x32xf32>
      %34 = vector.broadcast %33 : vector<1x32xf32> to vector<8x32xf32>
      %35 = arith.addf %32, %34 : vector<8x32xf32>
      %36 = arith.truncf %35 : vector<8x32xf32> to vector<8x32xbf16>
      %c0_20 = arith.constant 0 : index
      %c0_21 = arith.constant 0 : index
      %37 = vector.load %arg8[%c0_20, %c0_21] : memref<8x32xbf16, #tpu.memory_space<vmem>>, vector<8x32xbf16>
      tpu.vector_store %arg8[%c0_20, %c0_21], %36 {strides = array<i32>} : memref<8x32xbf16, #tpu.memory_space<vmem>>, vector<8x32xbf16>,
    } else {
    }
    %c0 = arith.constant 0 : index
    %c0_1 = arith.constant 0 : index
    %3 = vector.load %arg8[%c0, %c0_1] : memref<8x32xbf16, #tpu.memory_space<vmem>>, vector<8x32xbf16>
    %c0_2 = arith.constant 0 : index
    %c0_3 = arith.constant 0 : index
    %c0_4 = arith.constant 0 : index
    %4 = vector.load %arg5[%c0_2, %c0_3, %c0_4] : memref<1x32x128xbf16, #tpu.memory_space<vmem>>, vector<1x32x128xbf16>
    %5 = vector.shape_cast %4 : vector<1x32x128xbf16> to vector<32x128xbf16>
    %cst = arith.constant dense<0.000000e+00> : vector<8x128xf32>
    %6 = tpu.matmul %3, %5, %cst {dimension_numbers = #tpu.dot_dimension_numbers<[1], [0], [0], [1], [0, 0, 1, 1], [], []>} : vector<8x32xbf16>, vector<32x128xbf16>, vector<8x128xf32> -> vector<8x128xf32>
    %c0_5 = arith.constant 0 : index
    %c0_6 = arith.constant 0 : index
    %7 = vector.load %arg6[%c0_5, %c0_6] : memref<1x128xf32, #tpu.memory_space<vmem>>, vector<1x128xf32>
    %8 = vector.broadcast %7 : vector<1x128xf32> to vector<8x128xf32>
    %9 = arith.addf %6, %8 : vector<8x128xf32>
    %10 = arith.truncf %9 : vector<8x128xf32> to vector<8x128xbf16>
    %c0_7 = arith.constant 0 : index
    %c0_8 = arith.constant 0 : index
    %11 = vector.load %arg7[%c0_7, %c0_8] : memref<8x128xbf16, #tpu.memory_space<vmem>>, vector<8x128xbf16>
    tpu.vector_store %arg7[%c0_7, %c0_8], %10 {strides = array<i32>} : memref<8x128xbf16, #tpu.memory_space<vmem>>, vector<8x128xbf16>,
    return
  }
  func.func @transform_0(%arg0: i32, %arg1: i32) -> (i32, i32) {
    %c0_i32 = arith.constant 0 : i32
    %c0_i32_0 = arith.constant 0 : i32
    return %arg0, %c0_i32 : i32, i32
  }
  func.func @transform_1(%arg0: i32, %arg1: i32) -> (i32, i32) {
    %c0_i32 = arith.constant 0 : i32
    %c0_i32_0 = arith.constant 0 : i32
    %c0_i32_1 = arith.constant 0 : i32
    return %c0_i32, %c0_i32_0 : i32, i32
  }
  func.func @transform_2(%arg0: i32, %arg1: i32) -> (i32, i32) {
    %c0_i32 = arith.constant 0 : i32
    %c0_i32_0 = arith.constant 0 : i32
    %c0_i32_1 = arith.constant 0 : i32
    return %c0_i32, %c0_i32_0 : i32, i32
  }
  func.func @transform_3(%arg0: i32, %arg1: i32) -> (i32, i32, i32) {
    %c0_i32 = arith.constant 0 : i32
    %c0_i32_0 = arith.constant 0 : i32
    %c0_i32_1 = arith.constant 0 : i32
    return %arg1, %c0_i32, %c0_i32_0 : i32, i32, i32
  }
  func.func @transform_4(%arg0: i32, %arg1: i32) -> (i32, i32) {
    %c0_i32 = arith.constant 0 : i32
    %c0_i32_0 = arith.constant 0 : i32
    return %c0_i32, %arg1 : i32, i32
  }
  func.func @transform_5(%arg0: i32, %arg1: i32) -> (i32, i32) {
    %c0_i32 = arith.constant 0 : i32
    return %arg0, %arg1 : i32, i32
  }
}

</mosaic_0001>

<bundles_post_ra>
// kernel: tpu_custom_call.1
= control target key start
LH: loop header
LB: loop body
LE: loop exit
PB: predicated region body
PF: predicated region fallthrough
CT: control target
= control target key end

     0   :  { %s1330_s0 = inlined_call_operand.hbm [shape: bf16[16,32], index: 0, kind: input, shape index: {}]   ;;  %s1331_s1 = inlined_call_operand.vmem [shape: f32[1,32], index: 1, kind: input, shape index: {}]   ;;  %s1332_s2 = inlined_call_operand.vmem [shape: f32[1,32], index: 2, kind: input, shape index: {}]   ;;  %s1333_s3 = inlined_call_operand.hbm [shape: bf16[2,32,128], index: 3, kind: input, shape index: {}]   ;;  %s1334_s4 = inlined_call_operand.vmem [shape: f32[1,256], index: 4, kind: input, shape index: {}]   ;;  %s1335_s5 = inlined_call_operand.hbm [shape: bf16[16,256], index: 5, kind: output, shape index: {}]  }
   0x1   :  { %1349 = sst [smem:[#allocation20_spill]] %s1330_s0 }
   0x2   :  { %1350 = sst [smem:[#allocation21_spill]] %s1332_s2 }
   0x3   :  { %1351 = sst [smem:[#allocation22_spill]] %s1335_s5 }
   0x4   :  { %10 = vsyncpa [#allocation4], 0 }
   0x5   :  { %12 = vsyncpa [#allocation4 + $0x1], 0 }
   0x6   :  { %13 = vsyncpa [#allocation7], 0 }
   0x7   :  { %15 = vsyncpa [#allocation7 + $0x1], 0 }
   0x8   :  { %16 = vsyncpa [#allocation5], 0 }
   0x9   :  { %18 = vsyncpa [#allocation5 + $0x1], 0  ;;  %s975_s18 = smov 0   ;;  %s977_s19 = smov 0  }
   0xa   :  { %s979_s20 = smov 0   ;;  %s981_s21 = smov 0  }
   0xb   :  { %s983_s22 = smov 0   ;;  %s985_s23 = smov 0  }
   0xc   :  { %s987_s24 = smov 0   ;;  %s989_s25 = smov 0  }
   0xd   :  { %s991_s26 = smov 0   ;;  %s993_s27 = smov 0  }
   0xe   :  { %s995_s28 = smov 0   ;;  %s997_s29 = smov 0  }
   0xf   :  { %s999_s30 = smov 0   ;;  %s1001_s6 = smov 0  }
  0x10 LB: > { %1352 = sst [smem:[#allocation12_spill]] %s884_s18  ;;  %s550_s7 = sadd.s32 4294967295, %s936_s6   ;;  %s936_s6 = sphi %s1001_s6, %s24_s6   ;;  %s932_s30 = sphi %s999_s30, %s1389_s30   ;;  %s928_s29 = sphi %s997_s29, %s1401_s29   ;;  %s924_s28 = sphi %s995_s28, %s1387_s28   ;;  %s920_s27 = sphi %s993_s27, %s1400_s27   ;;  %s916_s26 = sphi %s991_s26, %s1399_s26   ;;  %s912_s25 = sphi %s989_s25, %s1398_s25   ;;  %s908_s24 = sphi %s987_s24, %s1397_s24   ;;  %s904_s23 = sphi %s985_s23, %s1396_s23   ;;  %s900_s22 = sphi %s983_s22, %s1395_s22   ;;  %s896_s21 = sphi %s981_s21, %s1394_s21   ;;  %s892_s20 = sphi %s979_s20, %s1393_s20   ;;  %s888_s19 = sphi %s977_s19, %s1392_s19   ;;  %s884_s18 = sphi %s975_s18, %s1391_s18  }
  0x11   : > { %1353 = sst [smem:[#allocation13_spill]] %s924_s28  ;;  %p50_p0 = scmp.ne.s32.totalorder %s916_s26, %s912_s25 }
  0x12   : > { %1354 = sst [smem:[#allocation14_spill]] %s932_s30  ;;  %p51_p1 = scmp.eq.s32.totalorder %s936_s6, 0 }
  0x13   : > { %1355 = sst [smem:[#allocation15_spill]] %s936_s6  ;;  %p56_p2 = scmp.ne.s32.totalorder %s912_s25, %s908_s24 }
  0x14   : > { %p57_p3 = scmp.eq.s32.totalorder %s550_s7, 0  ;;  %p118_p4 = scmp.ne.s32.totalorder %s904_s23, %s900_s22 }
  0x15   : > { %p1050_p5 = por %p51_p1, %p50_p0  ;;  %p124_p6 = scmp.ne.s32.totalorder %s900_s22, %s896_s21 }
  0x16   : > { %p1055_p7 = por %p57_p3, %p56_p2  ;;  %p120_p8 = por %p118_p4, %p51_p1 }
  0x17   : > { %p1059_p9 = por %p124_p6, %p57_p3  ;;  %p1063_p10 = scmp.eq.s32.totalorder %s550_s7, 3 }
  0x18   : > { %s1357_s11 = scalar_select %p1055_p7, 1, 0 }
  0x19   : > { %s1358_s12 = scalar_select %p1059_p9, 1, 0 }
  0x1a   : > { %p604_p11 = scmp.lt.s32.totalorder %s936_s6, 4  ;;  %s208_s14 = sand.u32 1, %s916_s26  }
  0x1b   : > { %s555_s15 = sshll.u32 %s932_s30, 6  ;;  %s554_s16 = sshll.u32 %s208_s14, 2 }
  0x1c   : > { %s1360_s0 = sld [smem:[#allocation20_spill]]  ;;  %s212_s9 = scalar_lea.vmem [#allocation3], %s554_s16 }
  0x1d   : > { %s219_s8 = sshll.u32 %s212_s9, 4  ;;  %p1077_p12 = pnand %p604_p11, %p1050_p5  ;;  %s1081_s8 = int_to_ptr.vmem [resolvable:$true] %s219_s8 }
  0x1e   : > { %p1083_p13 = pnand %p604_p11, %p120_p8 }
  0x1f   : > { %p728_p2 = pneg %p1077_p12 }
  0x20   : > { %s1362_s5 = scalar_select %p1083_p13, 1, 0 }
  0x22   : > { %s1073_s21 = scalar_lea.hbm %s1360_s0, %s555_s15  ;;  %s209_s15 = scalar_lea.sflag [#allocation4], %s208_s14 }
  0x23   : > { %s726_s17 = scalar_lea.hbm %s1073_s21, 64  ;;  %s731_s16 = scalar_lea.hbm %s1360_s0, 128 }
  0x24   : > { %p727_p1 = scmp.ne.s32.totalorder %s1073_s21, %s726_s17  ;;  %p732_p5 = scmp.lt.u32.totalorder %s1073_s21, %s1360_s0 }
  0x25   : > { %p733_p6 = scmp.lt.u32.totalorder %s731_s16, %s726_s17  ;;  %p735_p11 = scmp.lt.u32.totalorder %s726_s17, %s1073_s21 }
  0x26   : > { %p729_p3 = pnand %p728_p2, %p727_p1 }
  0x27   : > { %p734_p8 = por %p733_p6, %p732_p5 }
  0x28   : > { %p730_p4 = pneg %p729_p3 }
  0x29   : > { %p736_p0 = por %p735_p11, %p734_p8 }
  0x2b   : > { %p737_p9 = pnand %p736_p0, %p730_p4 }
  0x2d   : > { %740 = shalt.err (!%p737_p9)
}
  0x2e   : > { %s741_s14 = scalar_lea.vmem %s1081_s8, 64  ;;  %s938_s9 = smov [#allocation3]  }
  0x2f   : > { %p742_p1 = scmp.ne.s32.totalorder %s1081_s8, %s741_s14  ;;  %s746_s10 = sshll.u32 %s938_s9, 4  ;;  %s747_s10 = int_to_ptr.vmem [resolvable:$false] %s746_s10 }
  0x30   : > { %s748_s28 = scalar_lea.vmem %s747_s10, 128  ;;  %p749_p13 = scmp.lt.s32.totalorder %s1081_s8, %s747_s10 }
  0x31   : > { %p744_p3 = pnand %p742_p1, %p728_p2  ;;  %p750_p5 = scmp.lt.s32.totalorder %s748_s28, %s741_s14 }
  0x33   : > { %p745_p7 = pneg %p744_p3  ;;  %p751_p6 = por %p750_p5, %p749_p13 }
  0x35   : > { %p752_p8 = pnand %p751_p6, %p745_p7 }
  0x37   : > { %755 = shalt.err (!%p752_p8)
}
  0x38   : > { %596 = dma.hbm_to_vmem [thread:$0]  (!%p1077_p12), %s1073_s21, 64, %s1081_s8, %s209_s15  }
  0x39   : > { %p251_p7 = scmp.lt.s32.totalorder %s936_s6, 5  ;;  %p1363_p9 = scmp.ge.s32.totalorder %s936_s6, 1 }
  0x3a   : > { %s551_s17 = sadd.s32 4294967294, %s936_s6   ;;  %s33_s16 = sadd.s32 1, %s928_s29 }
  0x3b   : > { %p1116_p13 = pnand %p1363_p9, %p251_p7  ;;  %s111_s24 = sadd.s32 1, %s904_s23 }
  0x3c   : > { %p34_p0 = scmp.ge.s32.totalorder %s33_s16, 2  ;;  %s165_s14 = sadd.s32 1, %s892_s20 }
  0x3d   : > { %p175_p2 = scmp.ne.s32.totalorder %s892_s20, %s888_s19  ;;  %p181_p4 = scmp.ne.s32.totalorder %s888_s19, %s884_s18 }
  0x3e   : > { %s1403_s16 = smov (%p34_p0, %s33_s16), 0  ;;  %s1366_s8 = sadd.s32 1, %s932_s30 }
  0x3f   : > { %1365 = sst [smem:[#allocation16_spill]] %s1403_s16  ;;  %s1405_s8 = smov (!%p34_p0, %s1366_s8), %s932_s30 }
  0x40   : > { %s108_s21 = ssub.s32 %s928_s29, %s1403_s16  ;;  %p1137_p12 = por %p1063_p10, %p175_p2 }
  0x41   : > { %p38_p11 = scmp.ge.s32.totalorder %s1405_s8, 2  ;;  %p109_p1 = scmp.eq.s32.totalorder %s108_s21, 0 }
  0x42   : > { %s1367_s15 = scalar_select %p1137_p12, 1, 0 }
  0x43   : > { %p182_p3 = scmp.eq.s32.totalorder %s551_s17, 3  ;;  %s226_s9 = sand.u32 1, %s904_s23  }
  0x44   : > { %1368 = sst [smem:[#allocation17_spill]] %s1367_s15  ;;  %s1407_s8 = smov (%p38_p11, %s1405_s8), 0 }
  0x45   : > { %1369 = sst [smem:[#allocation18_spill]] %s1407_s8  ;;  %s40_s28 = ssub.s32 %s932_s30, %s1407_s8 }
  0x46   : > { %s1145_s10 = scalar_select %p109_p1, %s904_s23, %s111_s24  }
  0x47   : > { %p1149_p5 = por %p182_p3, %p181_p4  ;;  %p41_p10 = scmp.eq.s32.totalorder %s40_s28, 0 }
  0x48   : > { %1370 = sst [smem:[#allocation19_spill]] %s1145_s10  ;;  %s162_s13 = sor.u32 %s108_s21, %s40_s28 }
  0x49   : > { %s1371_s0 = scalar_select %p1149_p5, 1, 0 }
  0x4a   : > { %p163_p6 = scmp.eq.s32.totalorder %s162_s13, 0  ;;  %s1372_s16 = sadd.s32 1, %s916_s26 }
  0x4b   : > { %s1156_s18 = scalar_select %p41_p10, %s916_s26, %s1372_s16  }
  0x4c   : > { %s1159_s17 = scalar_select %p163_p6, %s892_s20, %s165_s14  }
  0x4d   : > { %s556_s6 = sshll.u32 %s226_s9, 4  ;;  %s575_s15 = sshll.u32 %s928_s29, 8 }
  0x4e   : > { %s1165_s8 = scalar_lea.hbm %s1333_s3, %s575_s15  ;;  %s230_s30 = scalar_lea.vmem [#allocation6], %s556_s6 }
  0x4f   : > { %s237_s10 = sshll.u32 %s230_s30, 4  ;;  %s1169_s21 = scalar_lea.sflag [#allocation7], %s226_s9  ;;  %s1167_s10 = int_to_ptr.vmem [resolvable:$true] %s237_s10 }
  0x50   : > { %s756_s16 = scalar_lea.hbm %s1165_s8, 256  ;;  %p1373_p7 = scmp.ne.s32.totalorder %s1362_s5, 0 }
  0x51   : > { %p757_p8 = scmp.ne.s32.totalorder %s1165_s8, %s756_s16  ;;  %s761_s15 = scalar_lea.hbm %s1333_s3, 512 }
  0x52   : > { %p758_p9 = pneg %p1373_p7  ;;  %p762_p4 = scmp.lt.u32.totalorder %s1165_s8, %s1333_s3 }
  0x53   : > { %p763_p11 = scmp.lt.u32.totalorder %s761_s15, %s756_s16  ;;  %p765_p3 = scmp.lt.u32.totalorder %s756_s16, %s1165_s8 }
  0x54   : > { %p759_p0 = pnand %p758_p9, %p757_p8 }
  0x55   : > { %p764_p1 = por %p763_p11, %p762_p4 }
  0x56   : > { %p760_p2 = pneg %p759_p0 }
  0x57   : > { %p766_p10 = por %p765_p3, %p764_p1 }
  0x59   : > { %p767_p6 = pnand %p766_p10, %p760_p2 }
  0x5b   : > { %770 = shalt.err (!%p767_p6)
}
  0x5c   : > { %s771_s30 = scalar_lea.vmem %s1167_s10, 256  ;;  %s939_s6 = smov [#allocation6]  }
  0x5d   : > { %p772_p8 = scmp.ne.s32.totalorder %s1167_s10, %s771_s30  ;;  %s776_s9 = sshll.u32 %s939_s6, 4  ;;  %s777_s9 = int_to_ptr.vmem [resolvable:$false] %s776_s9 }
  0x5e   : > { %s778_s24 = scalar_lea.vmem %s777_s9, 512  ;;  %p779_p12 = scmp.lt.s32.totalorder %s1167_s10, %s777_s9 }
  0x5f   : > { %p774_p0 = pnand %p772_p8, %p758_p9  ;;  %p780_p4 = scmp.lt.s32.totalorder %s778_s24, %s771_s30 }
  0x61   : > { %p775_p5 = pneg %p774_p0  ;;  %p781_p11 = por %p780_p4, %p779_p12 }
  0x63   : > { %p782_p1 = pnand %p781_p11, %p775_p5 }
  0x65   : > { %785 = shalt.err (!%p782_p1)
}
  0x66   : > { %s940_s16 = smov 64   ;;  %s941_s2 = smov 4  }
  0x67   : > { %599 = dma.hbm_to_vmem [thread:$0]  (!%p1373_p7), %s1165_s8, 256, %s1167_s10, %s1169_s21, %s940_s16, %s940_s16, %s941_s2  }
  0x68   : > { %255 = sbr.rel (%p1116_p13) target bundleno = 677 (0x2a5), region = 40  ;;  %s257_s14 = sand.u32 (!%p1116_p13), 1, %s912_s25  }
  0x69   : > { %s560_s15 = sshll.u32 (!%p1116_p13), %s257_s14, 2  ;;  %s258_s28 = scalar_lea.sflag (!%p1116_p13), [#allocation4], %s257_s14 }
  0x6a   : > { %s261_s13 = scalar_lea.vmem (!%p1116_p13), [#allocation3], %s560_s15  ;;  %p1374_p12 = scmp.ne.s32.totalorder (!%p1116_p13), %s1357_s11, 0 }
  0x6f   : > { %871 = dma.done.wait (%p1374_p12), %s258_s28, 64  }
  0x70   : > { %873 = vsyncadd (%p1374_p12), %s258_s28, 4294967232  ;;  %s266_s30 = sand.u32 1, %s900_s22   ;;  %p1375_p13 = scmp.ne.s32.totalorder %s1358_s12, 0 }
  0x71   : > { %s1205_s6 = sshll.u32 %s266_s30, 4  ;;  %s267_s5 = scalar_lea.sflag [#allocation7], %s266_s30 }
  0x72   : > { %s270_s7 = scalar_lea.vmem [#allocation6], %s1205_s6 }
  0x73   : > { %875 = dma.done.wait (%p1375_p13), %s267_s5, 256  }
  0x74   : > { %877 = vsyncadd (%p1375_p13), %s267_s5, 4294967040  ;;  %s302_s8 = sand.u32 1, %s888_s19   ;;  %p305_p5 = scmp.lt.s32.totalorder %s920_s27, 1 }
  0x75   : > { %s1216_s11 = sshll.u32 %s302_s8, 2  ;;  %p563_p7 = scmp.ne.s32.totalorder %s920_s27, 0 }
  0x76   : > { %s1219_s10 = scalar_select %p305_p5, %s920_s27, 1 }
  0x77   : > { %s304_s16 = scalar_lea.vmem [#allocation8], %s1216_s11  ;;  %312 = sbr.rel (%p563_p7) target bundleno = 438 (0x1b6), region = 52  ;;  %v313_v0 = vld [vmem:[%s261_s13] sm:$0xf] (!%p563_p7)  ;;  %vm315_vm0 = vcmask (!%p563_p7), 261120   ;;  %vm347_vm1 = vcmask (!%p563_p7), 257024  }
  0x78   : > { %s307_s24 = scalar_lea.vmem %s1334_s4, %s1219_s10  ;;  %v314_v1 = vunpack.c.l.bf16 (!%p563_p7), %v313_v0  ;;  %v564_v12 = vld [vmem:[%s1331_s1] ss:$0 sm:$0xff] (!%p563_p7)  ;;  %s1376_s28 = sld [smem:[#allocation21_spill]] (!%p563_p7) }
  0x7a   : > { %v316_v2 = vsel (!%p563_p7), %vm315_vm0, %v314_v1, 0.0 }
  0x7b   : > { %317 = vadd.xlane.f32.xlu0 (!%p563_p7), %v316_v2 }
  0x7e   : > { %v565_v14 = vld [vmem:[%s1376_s28] ss:$0 sm:$0xff] }
 0x108   : > { %v318_v3 = vpop.xlane.xlu0 %317 }
 0x109   : > { %v320_v4 = vmul.f32 0.03125, %v318_v3 }
 0x10b   : > { %v321_v5 = vsub.f32 %v314_v1, %v320_v4 }
 0x10d   : > { %v322_v6 = vmul.f32 %v321_v5, %v321_v5 }
 0x10f   : > { %v323_v7 = vsel %vm315_vm0, %v322_v6, 0.0 }
 0x110   : > { %324 = vadd.xlane.f32.xlu0 %v323_v7 }
 0x19d   : > { %v325_v8 = vpop.xlane.xlu0 %324 }
 0x19e   : > { %v326_v9 = vmul.f32 0.03125, %v325_v8 }
 0x1a0   : > { %v327_v10 = vadd.f32 1e-05, %v326_v9 }
 0x1a2   : > { %722 = vrsqrt.f32 %v327_v10 }
 0x1ac   : > { %v723_v11 = vpop.eup %722 }
 0x1ad   : > { %v329_v13 = vmul.f32 %v723_v11, %v321_v5 }
 0x1af   : > { %v337_v15 = vmul.f32 %v564_v12, %v329_v13 }
 0x1b1   : > { %v345_v16 = vadd.f32 %v565_v14, %v337_v15 }
 0x1b3   : > { %v346_v17 = vpack.c.bf16 %v345_v16, %v345_v16 }
 0x1b5   : > { %348 = vst.msk [vmem:[#allocation2] sm:$0xf] %vm347_vm1, %v346_v17 }
 0x1b6 PF: > { %s1377_s13 = sld [smem:[#allocation13_spill]]  ;;  %v724_v18 = vld [vmem:[%s270_s7] sm:$0xff]   ;;  %v942_v19 = vmov 0.0   ;;  %v725_v20 = vld [vmem:[%s270_s7 + $0x8] sm:$0xff]   ;;  %vm943_vm2 = vmmov 0   ;;  %vm373_vm3 = vcmask 261120  }
 0x1b7   : > { %579 = vmatprep.subr.bf16.mxu0 %v942_v19  ;;  %583 = vmatprep.mubr.msk.bf16.mxu0 %vm943_vm2, %v942_v19  ;;  %s1378_s12 = sld [smem:[#allocation17_spill]]  ;;  %v566_v22 = vld [vmem:[%s307_s24] ss:$0 sm:$0xff]  ;;  %s435_s7 = sshll.u32 %s304_s16, 4  ;;  %s1251_s7 = int_to_ptr.vmem [resolvable:$true] %s435_s7 }
 0x1b8   : > { %580 = vmatpush3.bf16.msra.mxu0 %v724_v18  ;;  %s1379_s15 = sld [smem:[#allocation22_spill]]  ;;  %s786_s10 = scalar_lea.vmem %s1251_s7, 64 }
 0x1b9   : > { %581 = vmatprep.subr.bf16.mxu0 %v942_v19  ;;  %p787_p9 = scmp.ne.s32.totalorder %s1251_s7, %s786_s10  ;;  %s944_s24 = smov [#allocation8]  }
 0x1bc   : > { %582 = vmatpush3.bf16.msra.mxu0 %v725_v20  ;;  %v349_v21 = vld [vmem:[#allocation2] sm:$0xf]  ;;  %s571_s30 = sshll.u32 %s1377_s13, 1  ;;  %s790_s13 = sshll.u32 %s944_s24, 4  ;;  %s791_s13 = int_to_ptr.vmem [resolvable:$false] %s790_s13 }
 0x1bd   : > { %s431_s5 = sadd.s32 %s920_s27, %s571_s30  ;;  %s420_s27 = scalar_lea.sflag [#allocation5], %s302_s8 }
 0x1be   : > { %s572_s6 = sshll.u32 %s431_s5, 6  ;;  %p1380_p2 = scmp.ne.s32.totalorder %s1378_s12, 0 }
 0x1bf   : > { %584 = vmatmul.mubr.msk.bf16.vlgmr.msra.gmra.mrb[0].mxu0 %vm373_vm3, %v349_v21  ;;  %s1249_s28 = scalar_lea.hbm %s1379_s15, %s572_s6  ;;  %s792_s30 = scalar_lea.vmem %s791_s13, 128 }
 0x1c0   : > { %p788_p3 = pnand %p787_p9, %p1380_p2  ;;  %p793_p6 = scmp.lt.s32.totalorder %s1251_s7, %s791_s13 }
 0x1c1   : > { %p794_p8 = scmp.lt.s32.totalorder %s792_s30, %s786_s10 }
 0x1c2   : > { %p789_p10 = pneg %p788_p3 }
 0x1c3   : > { %p795_p0 = por %p794_p8, %p793_p6 }
 0x1c5   : > { %p796_p4 = pnand %p795_p0, %p789_p10 }
 0x292   : > { %v411_v23 = vpop.f32.mrb[0].mxu0 }
 0x293   : > { %v412_v24 = vadd.f32 %v566_v22, %v411_v23  ;;  %v585_v25 = vpop.f32.mrb[1].mxu0 }
 0x294   : > { %v414_v26 = vpop.f32.mrb[2].mxu0 }
 0x295   : > { %v417_v27 = vpack.c.bf16 %v412_v24, %v412_v24  ;;  %v586_v28 = vpop.f32.mrb[3].mxu0 }
 0x297   : > { %418 = vst [vmem:[%s304_s16] sm:$0xf] %v417_v27 }
 0x298   : > { %799 = shalt.err (!%p796_p4)
}
 0x299   : > { %s800_s8 = scalar_lea.hbm %s1249_s28, 64  ;;  %s804_s5 = scalar_lea.hbm %s1379_s15, 256 }
 0x29a   : > { %p801_p11 = scmp.ne.s32.totalorder %s1249_s28, %s800_s8  ;;  %p805_p13 = scmp.lt.u32.totalorder %s1249_s28, %s1379_s15 }
 0x29b   : > { %p806_p5 = scmp.lt.u32.totalorder %s804_s5, %s800_s8  ;;  %p808_p9 = scmp.lt.u32.totalorder %s800_s8, %s1249_s28 }
 0x29c   : > { %p802_p1 = pnand %p801_p11, %p1380_p2 }
 0x29d   : > { %p807_p7 = por %p806_p5, %p805_p13 }
 0x29e   : > { %p803_p12 = pneg %p802_p1 }
 0x29f   : > { %p809_p3 = por %p808_p9, %p807_p7 }
 0x2a1   : > { %p810_p10 = pnand %p809_p3, %p803_p12 }
 0x2a3   : > { %813 = shalt.err (!%p810_p10)
}
 0x2a4   : > { %591 = dma.vmem_to_hbm [thread:$0]  (%p1380_p2), %s1251_s7, 64, %s1249_s28, %s420_s27  }
 0x2a5 PF: > { %s1381_s6 = sld [smem:[#allocation15_spill]]  ;;  %s1382_s2 = sld [smem:[#allocation12_spill]] }
 0x2a6   : > { %p1383_p8 = scmp.ne.s32.totalorder %s1371_s0, 0 }
 0x2ab   : > { %p605_p6 = scmp.ge.s32.totalorder %s1381_s6, 2  ;;  %s447_s14 = sand.u32 1, %s1382_s2  }
 0x2ac   : > { %s448_s10 = scalar_lea.sflag [#allocation5], %s447_s14 }
 0x2ad   : > { %p601_p0 = pnand %p605_p6, %p1383_p8 }
 0x2af   : > { %879 = dma.done.wait (!%p601_p0), %s448_s10, 64  }
 0x2b0   : > { %881 = vsyncadd (!%p601_p0), %s448_s10, 4294967232  ;;  %s24_s6 = sadd.s32 1, %s1381_s6   ;;  %s1385_s12 = sld [smem:[#allocation19_spill]] }
 0x2b1   : > { %p1283_p4 = scmp.ge.s32.totalorder %s24_s6, 6   ;;  %s1386_s7 = smov %s1156_s18 }
 0x2b2   : > { %s1387_s28 = sld [smem:[#allocation14_spill]]  ;;  %s1388_s0 = sld [smem:[#allocation16_spill]] }
 0x2b3   : > { %s1389_s30 = sld [smem:[#allocation18_spill]]  ;;  %s1391_s18 = smov %s888_s19 }
 0x2b4   : > { %s1392_s19 = smov %s892_s20  ;;  %s1393_s20 = smov %s1159_s17 }
 0x2b5   : > { %s1394_s21 = smov %s900_s22  ;;  %s1395_s22 = smov %s904_s23 }
 0x2b6   : > { %s1396_s23 = smov %s1385_s12  ;;  %s1397_s24 = smov %s912_s25 }
 0x2b7   : > { %s1398_s25 = smov %s916_s26  ;;  %s1399_s26 = smov %s1386_s7 }
 0x2b8   : > { %s1400_s27 = smov %s928_s29  ;;  %s1401_s29 = smov %s1388_s0 }
 0x2b9   :  { %23 = sbr.rel (!%p1283_p4) target bundleno = 16 (0x10), region = 105 }
 0x2c0   :  { %453 = vsyncpa [#allocation4], 1 }
 0x2c1   :  { %455 = vsyncpa [#allocation4 + $0x1], 1 }
 0x2c2   :  { %456 = vsyncpa [#allocation7], 1 }
 0x2c3   :  { %458 = vsyncpa [#allocation7 + $0x1], 1 }
 0x2c4   :  { %459 = vsyncpa [#allocation5], 1 }
 0x2c5   :  { %461 = vsyncpa [#allocation5 + $0x1], 1 }

</bundles_post_ra>
